<compile_context>
chip_gen: v7x
topology: tpu7x:2x2x1
jax: 0.10.0
libtpu: 0.0.40
codegen_flags: <defaults>
</compile_context>

<pallas_src>
from functools import partial

import jax
import jax.numpy as jnp
from jax.experimental import pallas as pl
from jax.experimental.pallas import tpu as pltpu


def _gce_kernel(logits_ref, targets_ref, out_ref, *, q, n_total, tile_n,
                steps, needs_mask):
    c = pl.program_id(0)   # batch-split index ("parallel": one per TensorCore on v7x)
    i = pl.program_id(1)   # reduction step within this split ("arbitrary")

    @pl.when(i == 0)
    def _():
        out_ref[...] = jnp.zeros_like(out_ref)

    raw = logits_ref[...]                                   # (tile_n, C) native dtype
    tgt = targets_ref[...]                                  # (tile_n, 1) int32
    tn, _ = raw.shape

    # Numerically-stable softmax statistics over the class (lane) dim, in f32.
    x = raw.astype(jnp.float32)
    row_max = jnp.max(x, axis=1, keepdims=True)                      # (tn, 1)
    sum_exp = jnp.sum(jnp.exp(x - row_max), axis=1, keepdims=True)   # (tn, 1)

    # Gather the raw logit at the target class on the native-dtype tile
    # (no one-hot materialization; cmp/select run at native width, exact sum).
    col = jax.lax.broadcasted_iota(jnp.int32, raw.shape, 1)
    logit_y = jnp.sum(jnp.where(col == tgt, raw, jnp.zeros_like(raw)),
                      axis=1, keepdims=True).astype(jnp.float32)     # (tn, 1)

    # Fused epilogue:  t = q * log_softmax(logits)[target]
    #                  contrib = CE * Yg**q * q = -t * exp(t)
    t = q * (logit_y - row_max - jnp.log(sum_exp))
    contrib = -t * jnp.exp(t)                                        # (tn, 1)

    def _accum(vals):
        partial_sum = jnp.sum(vals, axis=(0, 1), keepdims=True)      # (1, 1)
        out_ref[...] += jnp.broadcast_to(partial_sum.reshape(1, 1, 1),
                                         out_ref.shape)

    if needs_mask:
        row_start = (c * steps + i) * tile_n

        # Boundary (ragged) or duplicated (clamped excess) block: mask rows.
        @pl.when(row_start + tile_n > n_total)
        def _():
            rows = jax.lax.broadcasted_iota(jnp.int32, (tn, 1), 0) + row_start
            _accum(jnp.where(rows < n_total, contrib, 0.0))

        # Steady state: no lane-sparse mask work.
        @pl.when(row_start + tile_n <= n_total)
        def _():
            _accum(contrib)
    else:
        _accum(contrib)

    # TODO(synk): the PyTorch module raises NameError via a host-side np.isnan()
    # check on p / Yg; there is no in-kernel equivalent, NaN simply propagates
    # to the scalar result for the caller to inspect.
    # TODO(synk): only the forward value is implemented; the detach() on the
    # loss weight affects backward only and would need a custom VJP.


def _choose_tile_n(n, c, dtype_bytes):
    # Honest VMEM accounting: the class dim lane-pads to a multiple of 128 and
    # every (tile_n, 1) temporary lane-pads to 128 lanes (512 B/row each).
    # Budget ~20 MiB of working set so double-buffering never spills, even on
    # v7x's 64 MiB (32 MiB scoped-default) VMEM.  Budget-driven, no fixed cap.
    lane = 128
    c_pad = ((c + lane - 1) // lane) * lane
    per_row = (
        2 * c_pad * dtype_bytes     # logits block, double-buffered
        + 4 * c_pad * 4             # f32 full-tile intermediates (cast/exp/select)
        + 2 * 512                   # targets (tile_n,1) int32 block, double-buffered
        + 8 * 512                   # (tile_n,1) f32 row temporaries, lane-padded
    )
    budget = 20 * 1024 * 1024
    tile = budget // per_row
    if tile >= n:
        return n                    # single tile; block == full dim is always legal
    tile = max(8, (tile // 8) * 8)
    return min(tile, n)


def _vmem_estimate(tile_n, c, dtype_bytes):
    lane = 128
    c_pad = ((c + lane - 1) // lane) * lane
    t_pad = ((tile_n + 7) // 8) * 8
    return (2 * t_pad * c_pad * dtype_bytes
            + 4 * t_pad * c_pad * 4
            + 2 * t_pad * 512
            + 8 * t_pad * 512)


def generalized_ce_loss(logits, targets, q=0.7, tile_n=None):
    """logits: (N, C) float (any float dtype), targets: (N,) int.

    Returns the scalar float32 generalized CE loss (forward value of
    GeneralizedCELoss1).
    """
    n, c = logits.shape
    dtype_bytes = jnp.dtype(logits.dtype).itemsize
    if tile_n is None:
        tile_n = _choose_tile_n(n, c, dtype_bytes)
    tile_n = int(min(tile_n, n))
    if tile_n < n:
        tile_n = max(8, (tile_n // 8) * 8)
        if tile_n >= n:
            tile_n = n

    nblocks = pl.cdiv(n, tile_n)
    # Use both TensorCores on v7x (leading "parallel" axis); runs sequentially
    # and stays correct on 1-TC v5e/v6e.
    num_splits = 2 if nblocks >= 2 else 1
    steps = pl.cdiv(nblocks, num_splits)
    needs_mask = (num_splits * steps * tile_n) != n

    targets2d = targets.reshape(n, 1).astype(jnp.int32)

    def row_block(ci, ii):
        # Clamp excess blocks (odd block count under the 2-way split) onto the
        # last valid block; the kernel masks their rows out entirely.
        return (jnp.minimum(ci * steps + ii, nblocks - 1), 0)

    vmem_limit = _vmem_estimate(tile_n, c, dtype_bytes) + (4 << 20)
    vmem_limit = int(min(max(vmem_limit, 16 << 20), 48 << 20))

    cost = pl.CostEstimate(
        flops=6 * n * c,
        transcendentals=n * c + 2 * n,     # exp/elem + (log, exp)/row
        bytes_accessed=n * c * dtype_bytes + n * 4 + num_splits * 8 * 128 * 4,
    )

    partials = pl.pallas_call(
        partial(_gce_kernel, q=float(q), n_total=n, tile_n=tile_n,
                steps=steps, needs_mask=needs_mask),
        out_shape=jax.ShapeDtypeStruct((num_splits, 8, 128), jnp.float32),
        grid=(num_splits, steps),
        in_specs=[
            pl.BlockSpec((tile_n, c), row_block),
            pl.BlockSpec((tile_n, 1), row_block),
        ],
        out_specs=pl.BlockSpec((1, 8, 128), lambda ci, ii: (ci, 0, 0)),
        compiler_params=pltpu.CompilerParams(
            dimension_semantics=("parallel", "arbitrary"),
            vmem_limit_bytes=vmem_limit,
        ),
        cost_estimate=cost,
    )(logits, targets2d)

    # Final cross-split reduction + mean: tiny XLA epilogue.
    return jnp.sum(partials[:, 0, 0]) / jnp.float32(n)


def _reference(logits, targets, q):
    logp = jax.nn.log_softmax(logits.astype(jnp.float32), axis=1)
    log_p_y = jnp.take_along_axis(logp, targets[:, None], axis=1)[:, 0]
    ce = -log_p_y
    yg = jnp.exp(log_p_y)
    return jnp.mean(ce * (yg ** q) * q)


if __name__ == "__main__":
    key = jax.random.PRNGKey(0)
    k1, k2, k3, k4, k5, k6 = jax.random.split(key, 6)

    # Test 1: small single-tile case (batch=8, classes=32).
    N, C = 8, 32
    logits = jax.random.normal(k1, (N, C), dtype=jnp.float32)
    targets = jax.random.randint(k2, (N,), 0, C, dtype=jnp.int32)
    loss = generalized_ce_loss(logits, targets, q=0.7)
    jax.block_until_ready(loss)
    ref = _reference(logits, targets, 0.7)
    assert jnp.allclose(loss, ref, rtol=1e-5, atol=1e-5), (loss, ref)

    # Test 2: dual-split grid with a ragged last block AND a fully out-of-range
    # (clamped + masked) trailing block (batch=20, tile_n=8 -> 3 blocks, 2 splits).
    N2, C2 = 20, 32
    logits2 = jax.random.normal(k3, (N2, C2), dtype=jnp.float32)
    targets2 = jax.random.randint(k4, (N2,), 0, C2, dtype=jnp.int32)
    loss2 = generalized_ce_loss(logits2, targets2, q=0.7, tile_n=8)
    jax.block_until_ready(loss2)
    ref2 = _reference(logits2, targets2, 0.7)
    assert jnp.allclose(loss2, ref2, rtol=1e-5, atol=1e-5), (loss2, ref2)

    # Test 3: bf16 logits (native-dtype DMA + native-dtype gather), even dual
    # split, no masking path (batch=32, classes=40, tile_n=16).
    N3, C3 = 32, 40
    logits3 = jax.random.normal(k5, (N3, C3), dtype=jnp.bfloat16)
    targets3 = jax.random.randint(k6, (N3,), 0, C3, dtype=jnp.int32)
    loss3 = generalized_ce_loss(logits3, targets3, q=0.7, tile_n=16)
    jax.block_until_ready(loss3)
    ref3 = _reference(logits3, targets3, 0.7)
    assert jnp.allclose(loss3, ref3, rtol=1e-4, atol=1e-5), (loss3, ref3)

    print("KERNEL_OK")
</pallas_src>

<mosaic_0001>
module attributes {stable_mosaic.version = 11 : i64} {
  func.func @_gce_kernel(%arg0: i32, %arg1: i32, %arg2: memref<8x32xf32, #tpu.memory_space<vmem>>, %arg3: memref<8x1xi32, #tpu.memory_space<vmem>>, %arg4: memref<1x8x128xf32, #tpu.memory_space<vmem>>) attributes {dimension_semantics = [#tpu.dimension_semantics<parallel>, #tpu.dimension_semantics<arbitrary>], iteration_bounds = array<i64: 1, 1>, scalar_prefetch = 0 : i64, scratch_operands = 0 : i64, tpu.core_type = #tpu.core_type<tc>, window_params = [{transform_indices = @transform_0, window_bounds = array<i64: 8, 32>}, {transform_indices = @transform_1, window_bounds = array<i64: 8, 1>}, {transform_indices = @transform_2, window_bounds = array<i64: 1, 8, 128>}]} {
    %c0_i32 = arith.constant 0 : i32
    %0 = arith.cmpi eq, %arg1, %c0_i32 : i32
    %1 = arith.extui %0 : i1 to i32
    %c0_i32_0 = arith.constant 0 : i32
    %2 = arith.cmpi ne, %1, %c0_i32_0 : i32
    scf.if %2 {
      %cst_16 = arith.constant 0.000000e+00 : f32
      %39 = vector.broadcast %cst_16 : f32 to vector<1x8x128xf32>
      %c0_17 = arith.constant 0 : index
      %c0_18 = arith.constant 0 : index
      %c0_19 = arith.constant 0 : index
      %40 = vector.load %arg4[%c0_17, %c0_18, %c0_19] : memref<1x8x128xf32, #tpu.memory_space<vmem>>, vector<1x8x128xf32>
      tpu.vector_store %arg4[%c0_17, %c0_18, %c0_19], %39 {strides = array<i32>} : memref<1x8x128xf32, #tpu.memory_space<vmem>>, vector<1x8x128xf32>,
    } else {
    }
    %c0 = arith.constant 0 : index
    %c0_1 = arith.constant 0 : index
    %3 = vector.load %arg2[%c0, %c0_1] : memref<8x32xf32, #tpu.memory_space<vmem>>, vector<8x32xf32>
    %c0_2 = arith.constant 0 : index
    %c0_3 = arith.constant 0 : index
    %4 = vector.load %arg3[%c0_2, %c0_3] : memref<8x1xi32, #tpu.memory_space<vmem>>, vector<8x1xi32>
    %cst = arith.constant dense<0xFF800000> : vector<8xf32>
    %5 = vector.multi_reduction <maximumf>, %3, %cst [1] : vector<8x32xf32> to vector<8xf32>
    %6 = vector.shape_cast %5 : vector<8xf32> to vector<8x1xf32>
    %7 = vector.broadcast %6 : vector<8x1xf32> to vector<8x32xf32>
    %8 = arith.subf %3, %7 : vector<8x32xf32>
    %9 = math.exp %8 : vector<8x32xf32>
    %cst_4 = arith.constant dense<0.000000e+00> : vector<8xf32>
    %10 = vector.multi_reduction <add>, %9, %cst_4 [1] : vector<8x32xf32> to vector<8xf32>
    %11 = vector.shape_cast %10 : vector<8xf32> to vector<8x1xf32>
    %12 = tpu.iota {dimensions = array<i32: 1>} : vector<8x32xi32>
    %13 = vector.broadcast %4 : vector<8x1xi32> to vector<8x32xi32>
    %14 = arith.cmpi eq, %12, %13 : vector<8x32xi32>
    %cst_5 = arith.constant 0.000000e+00 : f32
    %15 = vector.broadcast %cst_5 : f32 to vector<8x32xf32>
    %16 = arith.select %14, %3, %15 : vector<8x32xi1>, vector<8x32xf32>
    %cst_6 = arith.constant dense<0.000000e+00> : vector<8xf32>
    %17 = vector.multi_reduction <add>, %16, %cst_6 [1] : vector<8x32xf32> to vector<8xf32>
    %18 = vector.shape_cast %17 : vector<8xf32> to vector<8x1xf32>
    %19 = arith.subf %18, %6 : vector<8x1xf32>
    %20 = math.log %11 : vector<8x1xf32>
    %21 = arith.subf %19, %20 : vector<8x1xf32>
    %cst_7 = arith.constant 0.699999988 : f32
    %22 = vector.broadcast %cst_7 : f32 to vector<8x1xf32>
    %23 = arith.mulf %22, %21 : vector<8x1xf32>
    %cst_8 = arith.constant 0.000000e+00 : f32
    %24 = vector.broadcast %cst_8 : f32 to vector<8x1xf32>
    %25 = arith.subf %24, %23 : vector<8x1xf32>
    %26 = math.exp %23 : vector<8x1xf32>
    %27 = arith.mulf %25, %26 : vector<8x1xf32>
    %28 = vector.shape_cast %27 : vector<8x1xf32> to vector<1x8x1xf32>
    %cst_9 = arith.constant dense<0.000000e+00> : vector<1xf32>
    %29 = vector.multi_reduction <add>, %28, %cst_9 [1, 2] : vector<1x8x1xf32> to vector<1xf32>
    %30 = vector.shape_cast %29 : vector<1xf32> to vector<1x1x1xf32>
    %31 = vector.extract %30[0, 0, 0] : f32 from vector<1x1x1xf32>
    %32 = vector.broadcast %31 : f32 to vector<1x1xf32>
    %c0_10 = arith.constant 0 : index
    %c0_11 = arith.constant 0 : index
    %c0_12 = arith.constant 0 : index
    %33 = vector.load %arg4[%c0_10, %c0_11, %c0_12] : memref<1x8x128xf32, #tpu.memory_space<vmem>>, vector<1x8x128xf32>
    %34 = vector.shape_cast %32 : vector<1x1xf32> to vector<1x1x1xf32>
    %35 = vector.shape_cast %34 : vector<1x1x1xf32> to vector<1x1x1xf32>
    %36 = vector.broadcast %35 : vector<1x1x1xf32> to vector<1x8x128xf32>
    %37 = arith.addf %33, %36 : vector<1x8x128xf32>
    %c0_13 = arith.constant 0 : index
    %c0_14 = arith.constant 0 : index
    %c0_15 = arith.constant 0 : index
    %38 = vector.load %arg4[%c0_13, %c0_14, %c0_15] : memref<1x8x128xf32, #tpu.memory_space<vmem>>, vector<1x8x128xf32>
    tpu.vector_store %arg4[%c0_13, %c0_14, %c0_15], %37 {strides = array<i32>} : memref<1x8x128xf32, #tpu.memory_space<vmem>>, vector<1x8x128xf32>,
    return
  }
  func.func @transform_0(%arg0: i32, %arg1: i32) -> (i32, i32) {
    %c1_i32 = arith.constant 1 : i32
    %0 = arith.muli %arg0, %c1_i32 : i32
    %1 = arith.addi %0, %arg1 : i32
    %c0_i32 = arith.constant 0 : i32
    %2 = arith.minsi %1, %c0_i32 : i32
    %c0_i32_0 = arith.constant 0 : i32
    %c0_i32_1 = arith.constant 0 : i32
    return %2, %c0_i32_0 : i32, i32
  }
  func.func @transform_1(%arg0: i32, %arg1: i32) -> (i32, i32) {
    %c1_i32 = arith.constant 1 : i32
    %0 = arith.muli %arg0, %c1_i32 : i32
    %1 = arith.addi %0, %arg1 : i32
    %c0_i32 = arith.constant 0 : i32
    %2 = arith.minsi %1, %c0_i32 : i32
    %c0_i32_0 = arith.constant 0 : i32
    %c0_i32_1 = arith.constant 0 : i32
    return %2, %c0_i32_0 : i32, i32
  }
  func.func @transform_2(%arg0: i32, %arg1: i32) -> (i32, i32, i32) {
    %c0_i32 = arith.constant 0 : i32
    %c0_i32_0 = arith.constant 0 : i32
    %c0_i32_1 = arith.constant 0 : i32
    return %arg0, %c0_i32, %c0_i32_0 : i32, i32, i32
  }
}

</mosaic_0001>

<bundles_post_ra>
// kernel: tpu_custom_call.1
= control target key start
LH: loop header
LB: loop body
LE: loop exit
PB: predicated region body
PF: predicated region fallthrough
CT: control target
= control target key end

     0   :  { %vm73_vm0 = vcmask 261120   ;;  %s217_s0 = inlined_call_operand.vmem [shape: f32[8,32], index: 0, kind: input, shape index: {}]   ;;  %s218_s1 = inlined_call_operand.vmem [shape: s32[8,1], index: 1, kind: input, shape index: {}]   ;;  %s219_s2 = inlined_call_operand.hbm [shape: f32[1,8,128], index: 2, kind: output, shape index: {}]  }
   0x1   :  { %v71_v0 = vld [vmem:[%s217_s0] sm:$0xff] }
   0x2   :  { %7 = vsyncpa [#allocation3], 0  ;;  %v74_v1 = vsel %vm73_vm0, %v71_v0, -inf  ;;  %v179_v2 = vmov 0   ;;  %v72_v3 = vld [vmem:[%s218_s1] sm:$0xff]  ;;  %v83_v7 = vlaneseq  ;;  %vm102_vm2 = vcmask 7168  }
   0x3   :  { %148 = vset.pattern.permute.xlu0 %v179_v2  ;;  %s180_s0 = smov [#allocation2]  }
   0x4   :  { %75 = vmax.xlane.f32.xlu0 %v74_v1  ;;  %v84_v8 = vand.u32 127, %v83_v7  ;;  %s123_s1 = sshll.u32 %s180_s0, 4  ;;  %s124_s1 = int_to_ptr.vmem [resolvable:$true] %s123_s1 }
   0x5   :  { %s155_s14 = scalar_lea.vmem %s124_s1, 128  ;;  %p160_p1 = scmp.lt.s32.totalorder %s124_s1, %s124_s1 }
   0x6   :  { %p156_p0 = scmp.ne.s32.totalorder %s124_s1, %s155_s14  ;;  %p161_p2 = scmp.lt.s32.totalorder %s155_s14, %s155_s14 }
   0x8   :  { %p162_p3 = por %p161_p2, %p160_p1 }
   0xa   :  { %p163_p4 = pnand %p162_p3, %p156_p0 }
  0x1a   :  { %86 = vperm.xlu0 %148, %v72_v3  }
  0x91   :  { %v76_v4 = vpop.xlane.xlu0 %75 }
  0x92   :  { %v77_v5 = vsub.f32 %v71_v0, %v76_v4 }
  0x94   :  { %v78_v6 = vmul.f32 1.442695, %v77_v5 }
  0x96   :  { %149 = vpow2.f32 %v78_v6 }
  0x99   :  { %v87_v9 = vpop.permute.xlu0 %86 }
  0x9a   :  { %vm88_vm1 = vcmp.eq.s32.totalorder %v84_v8, %v87_v9 }
  0x9b   :  { %v89_v11 = vsel %vm88_vm1, %v71_v0, 0.0 }
  0x9c   :  { %v90_v13 = vsel %vm73_vm0, %v89_v11, 0.0 }
  0xa0   :  { %v150_v10 = vpop.eup %149 }
  0xa1   :  { %v80_v12 = vsel %vm73_vm0, %v150_v10, 0.0 }
  0xa2   :  { %81 = vadd.xlane.f32.xlu1 %v80_v12 }
  0xa6   :  { %91 = vadd.xlane.f32.xlu1 %v90_v13 }
 0x12f   :  { %v82_v14 = vpop.xlane.xlu1 %81 }
 0x130   :  { %151 = vlog2.f32 %v82_v14 }
 0x133   :  { %v92_v15 = vpop.xlane.xlu1 %91 }
 0x134   :  { %v93_v18 = vsub.f32 %v92_v15, %v76_v4 }
 0x13a   :  { %v152_v16 = vpop.eup %151 }
 0x13b   :  { %v95_v17 = vmul.f32 0.6931472, %v152_v16 }
 0x13d   :  { %v96_v19 = vsub.f32 %v93_v18, %v95_v17 }
 0x13f   :  { %v97_v20 = vmul.f32 0.7, %v96_v19 }
 0x141   :  { %v99_v21 = vmul.f32 1.442695, %v97_v20  ;;  %v98_v22 = vsub.f32 0.0, %v97_v20 }
 0x143   :  { %153 = vpow2.f32 %v99_v21 }
 0x14d   :  { %v154_v23 = vpop.eup %153 }
 0x14e   :  { %v101_v24 = vmul.f32 %v154_v23, %v98_v22 }
 0x150   :  { %v103_v25 = vsel %vm102_vm2, %v101_v24, 0.0 }
 0x151   :  { %104 = vadd.xlane.f32.xlu1 %v103_v25 }
 0x1de   :  { %v105_v26 = vpop.xlane.xlu1 %104 }
 0x1df   :  { %v106_v27 = vrot.slane %v105_v26, 4 }
 0x1e1   :  { %v107_v28 = vadd.f32 %v106_v27, %v105_v26 }
 0x1e3   :  { %v108_v29 = vrot.slane %v107_v28, 2 }
 0x1e5   :  { %v109_v30 = vadd.f32 %v108_v29, %v107_v28 }
 0x1e7   :  { %v110_v31 = vrot.slane %v109_v30, 1 }
 0x1e9   :  { %v111_v32 = vadd.f32 %v110_v31, %v109_v30 }
 0x1eb   :  { %143 = vpush %v111_v32 }
 0x21c   :  { %s144_s13 = spop %143 }
 0x21d   :  { %v114_v33 = vstv %s144_s13 }
 0x21e   :  { %116 = vst [vmem:[#allocation2] sm:$0xff] %v114_v33 }
 0x21f   :  { %166 = shalt.err (!%p163_p4)
}
 0x220   :  { %s167_s17 = scalar_lea.hbm %s219_s2, 128 }
 0x221   :  { %p168_p5 = scmp.ne.s32.totalorder %s219_s2, %s167_s17  ;;  %p171_p6 = scmp.lt.u32.totalorder %s167_s17, %s219_s2 }
 0x223   :  { %p173_p7 = pnand %p171_p6, %p168_p5 }
 0x225   :  { %176 = shalt.err (!%p173_p7)
}
 0x226   :  { %126 = dma.vmem_to_hbm [thread:$0]  %s124_s1, 128, %s219_s2, [#allocation3]  }
 0x227   :  { %177 = dma.done.wait [#allocation3], 128  }
 0x228   :  { %178 = vsyncadd [#allocation3], 4294967168 }
 0x229   :  { %130 = vsyncpa [#allocation3], 1 }

</bundles_post_ra>
